<compile_context>
chip_gen: v7x
topology: tpu7x:2x2x1
jax: 0.10.0
libtpu: 0.0.40
codegen_flags: <defaults>
</compile_context>

<pallas_src>
import math
from functools import partial

import jax
import jax.numpy as jnp
from jax.experimental import pallas as pl
from jax.experimental.pallas import tpu as pltpu


_TWO_PI = 2.0 * math.pi
_BLOCK_BYTES_SAFE = 2 * 1024 * 1024     # per-stream block, safe on v7x (64 MiB VMEM)
_BLOCK_BYTES_BIG = 4 * 1024 * 1024      # per-stream block for v5e/v6e (128 MiB VMEM)
_VMEM_LIMIT_SAFE = 32 * 1024 * 1024
_VMEM_LIMIT_BIG = 48 * 1024 * 1024


def _round_up(x, m):
    return (x + m - 1) // m * m


def _largest_divisor_tile(dim, unit, cap):
    """Largest multiple of `unit` that divides `dim` and is <= cap.

    Requires dim % unit == 0 (guaranteed by padding), so `unit` always works."""
    cap = min(cap, dim)
    t = (cap // unit) * unit
    while t >= unit:
        if dim % t == 0:
            return t
        t -= unit
    return unit


def _device_budget(itemsize):
    """(block_elems, vmem_limit_bytes), generation-dependent with a safe fallback."""
    block_bytes, vmem_limit = _BLOCK_BYTES_SAFE, _VMEM_LIMIT_SAFE
    try:
        info = pltpu.get_tpu_info()
        vmem_cap = getattr(info, "vmem_capacity_bytes", None)
        if vmem_cap is not None and vmem_cap >= 96 * 1024 * 1024:
            block_bytes, vmem_limit = _BLOCK_BYTES_BIG, _VMEM_LIMIT_BIG
    except Exception:
        pass  # unknown generation -> conservative settings (valid everywhere)
    return max(1, block_bytes // itemsize), vmem_limit


def _choose_tiles(bcp, hwp, block_elems, sub):
    """Lane-dim-first tile selection; bcp % sub == 0, hwp % 128 == 0 required."""
    lane_cap = max(128, block_elems // sub)
    tn = hwp if hwp <= lane_cap else _largest_divisor_tile(hwp, 128, lane_cap)
    row_cap = max(sub, (block_elems // tn) // sub * sub)
    tm = bcp if bcp <= row_cap else _largest_divisor_tile(bcp, sub, row_cap)
    return tm, tn


def _phase_mask_kernel(c_ref, s_ref, fre_ref, fim_ref, ore_ref, oim_ref):
    c = c_ref[...]                               # (1, tn) broadcast over sublanes
    s = s_ref[...]
    fre = fre_ref[...]                           # (tm, tn)
    fim = fim_ref[...]
    # complex multiply: (fre + i*fim) * (c + i*s)
    ore_ref[...] = (fre * c - fim * s).astype(ore_ref.dtype)
    oim_ref[...] = (fre * s + fim * c).astype(oim_ref.dtype)


@partial(jax.jit, static_argnames=("levels", "modulo", "return_planar"))
def phase_mask_quantized(phase_raw, field_re, field_im, *, levels=16,
                         modulo=False, return_planar=False):
    """Pallas implementation of PhaseMaskQuantized.forward.

    Args:
      phase_raw: (H, W) float32 trainable phase.
      field_re, field_im: (B, C, H, W) real/imag parts of the field.
      levels: number of discrete phase levels.
      modulo: wrap phase into [0, 2*pi) (torch.remainder semantics) first.
      return_planar: if True return (out_re, out_im) and skip the extra
        complex-recombination HBM pass.
    """
    B, C, H, W = field_re.shape
    BC, HW = B * C, H * W
    dtype = field_re.dtype
    itemsize = jnp.dtype(dtype).itemsize
    sub = 8 * max(1, 4 // itemsize)              # sublane unit: 8 f32 / 16 bf16 / 32 int8

    # Lane-dense flattening: (B*C, H*W). Reshapes are free under jit.
    fre2 = field_re.reshape(BC, HW)
    fim2 = field_im.reshape(BC, HW)
    ph2 = phase_raw.astype(jnp.float32).reshape(1, HW)

    # Pad awkward shapes to (sub, 128) multiples so every block stays within the
    # VMEM budget (padded rows/lanes are zero and sliced off on the way out).
    BCp, HWp = _round_up(BC, sub), _round_up(HW, 128)
    if (BCp, HWp) != (BC, HW):
        fre2 = jnp.pad(fre2, ((0, BCp - BC), (0, HWp - HW)))
        fim2 = jnp.pad(fim2, ((0, BCp - BC), (0, HWp - HW)))
        ph2 = jnp.pad(ph2, ((0, 0), (0, HWp - HW)))

    # Hoisted quantized-phase cos/sin: a tiny (1, HWp) XLA op, negligible HBM
    # traffic vs. the (BCp, HWp) field streams. Keeps the kernel branch-free and
    # both grid axes "parallel".
    phase = jnp.mod(ph2, _TWO_PI) if modulo else ph2      # torch.remainder semantics
    step = _TWO_PI / levels
    q = jnp.round(phase / step) * step                     # round-half-to-even == torch
    cq = jnp.cos(q).astype(dtype)
    sq = jnp.sin(q).astype(dtype)

    block_elems, vmem_limit = _device_budget(itemsize)
    tm, tn = _choose_tiles(BCp, HWp, block_elems, sub)
    n_row, n_col = BCp // tm, HWp // tn

    out_re2, out_im2 = pl.pallas_call(
        _phase_mask_kernel,
        out_shape=(
            jax.ShapeDtypeStruct((BCp, HWp), dtype),
            jax.ShapeDtypeStruct((BCp, HWp), dtype),
        ),
        grid_spec=pltpu.PrefetchScalarGridSpec(
            num_scalar_prefetch=0,
            grid=(n_row, n_col),
            in_specs=[
                pl.BlockSpec((1, tn), lambda i, j: (0, j)),    # cos(phase_quant)
                pl.BlockSpec((1, tn), lambda i, j: (0, j)),    # sin(phase_quant)
                pl.BlockSpec((tm, tn), lambda i, j: (i, j)),   # field re
                pl.BlockSpec((tm, tn), lambda i, j: (i, j)),   # field im
            ],
            out_specs=[
                pl.BlockSpec((tm, tn), lambda i, j: (i, j)),
                pl.BlockSpec((tm, tn), lambda i, j: (i, j)),
            ],
        ),
        compiler_params=pltpu.CompilerParams(
            # No cross-iteration state -> both axes parallel (v7x megacore sharding
            # works even when one axis has a single block).
            dimension_semantics=("parallel", "parallel"),
            vmem_limit_bytes=vmem_limit,
        ),
    )(cq, sq, fre2, fim2)

    out_re = out_re2[:BC, :HW].reshape(B, C, H, W)
    out_im = out_im2[:BC, :HW].reshape(B, C, H, W)
    if return_planar:
        return out_re, out_im
    # Module-faithful complex64 output (one extra HBM pass; prefer
    # return_planar=True when the consumer can take planar re/im).
    return jax.lax.complex(out_re, out_im)


def phase_mask_quantized_ref(phase_raw, field_re, field_im, *, levels=16,
                             modulo=False):
    """Pure-JAX reference mirroring the PyTorch forward."""
    two_pi = 2.0 * math.pi
    phase = jnp.mod(phase_raw, two_pi) if modulo else phase_raw
    step = two_pi / levels
    phase_quant = jnp.round(phase / step) * step
    phase_c = jnp.exp(1j * phase_quant.astype(jnp.complex64))
    field = field_re + 1j * field_im
    return field * phase_c[None, None, :, :]


if __name__ == "__main__":
    levels = 16

    # --- Case 1: standard shapes, planar fast path + complex/modulo path. ---
    key = jax.random.PRNGKey(0)
    B, C, H, W = 2, 4, 16, 16
    k_phase, k_re, k_im = jax.random.split(key, 3)
    # Parameter init: 2*pi * uniform(H, W), like the PyTorch __init__.
    phase_raw = _TWO_PI * jax.random.uniform(k_phase, (H, W), dtype=jnp.float32)
    field_re = jax.random.normal(k_re, (B, C, H, W), dtype=jnp.float32)
    field_im = jax.random.normal(k_im, (B, C, H, W), dtype=jnp.float32)

    out_re, out_im = jax.block_until_ready(
        phase_mask_quantized(phase_raw, field_re, field_im, levels=levels,
                             modulo=False, return_planar=True))
    ref = phase_mask_quantized_ref(phase_raw, field_re, field_im,
                                   levels=levels, modulo=False)
    assert out_re.shape == (B, C, H, W) and out_im.shape == (B, C, H, W)
    assert jnp.max(jnp.abs(out_re - ref.real)) < 1e-4
    assert jnp.max(jnp.abs(out_im - ref.imag)) < 1e-4

    out_mod = jax.block_until_ready(
        phase_mask_quantized(phase_raw, field_re, field_im,
                             levels=levels, modulo=True))
    ref_mod = phase_mask_quantized_ref(phase_raw, field_re, field_im,
                                       levels=levels, modulo=True)
    assert out_mod.shape == (B, C, H, W) and out_mod.dtype == jnp.complex64
    assert jnp.max(jnp.abs(out_mod - ref_mod)) < 1e-4

    # --- Case 2: awkward (non-8/128-divisible) shape exercising the padded path. ---
    B2, C2, H2, W2 = 1, 3, 10, 12
    k2p, k2r, k2i = jax.random.split(jax.random.PRNGKey(1), 3)
    phase2 = _TWO_PI * jax.random.uniform(k2p, (H2, W2), dtype=jnp.float32)
    fre_b = jax.random.normal(k2r, (B2, C2, H2, W2), dtype=jnp.float32)
    fim_b = jax.random.normal(k2i, (B2, C2, H2, W2), dtype=jnp.float32)
    out2 = jax.block_until_ready(
        phase_mask_quantized(phase2, fre_b, fim_b, levels=levels, modulo=False))
    ref2 = phase_mask_quantized_ref(phase2, fre_b, fim_b,
                                    levels=levels, modulo=False)
    assert out2.shape == (B2, C2, H2, W2)
    assert jnp.max(jnp.abs(out2 - ref2)) < 1e-4

    print("KERNEL_OK")
</pallas_src>

<mosaic_0001>
module attributes {stable_mosaic.version = 11 : i64} {
  func.func @_phase_mask_kernel(%arg0: i32, %arg1: i32, %arg2: memref<1x256xf32, #tpu.memory_space<vmem>>, %arg3: memref<1x256xf32, #tpu.memory_space<vmem>>, %arg4: memref<8x256xf32, #tpu.memory_space<vmem>>, %arg5: memref<8x256xf32, #tpu.memory_space<vmem>>, %arg6: memref<8x256xf32, #tpu.memory_space<vmem>>, %arg7: memref<8x256xf32, #tpu.memory_space<vmem>>) attributes {dimension_semantics = [#tpu.dimension_semantics<parallel>, #tpu.dimension_semantics<parallel>], iteration_bounds = array<i64: 1, 1>, scalar_prefetch = 0 : i64, scratch_operands = 0 : i64, tpu.core_type = #tpu.core_type<tc>, window_params = [{transform_indices = @transform_0, window_bounds = array<i64: 1, 256>}, {transform_indices = @transform_1, window_bounds = array<i64: 1, 256>}, {transform_indices = @transform_2, window_bounds = array<i64: 8, 256>}, {transform_indices = @transform_3, window_bounds = array<i64: 8, 256>}, {transform_indices = @transform_4, window_bounds = array<i64: 8, 256>}, {transform_indices = @transform_5, window_bounds = array<i64: 8, 256>}]} {
    %c0 = arith.constant 0 : index
    %c0_0 = arith.constant 0 : index
    %0 = vector.load %arg2[%c0, %c0_0] : memref<1x256xf32, #tpu.memory_space<vmem>>, vector<1x256xf32>
    %c0_1 = arith.constant 0 : index
    %c0_2 = arith.constant 0 : index
    %1 = vector.load %arg3[%c0_1, %c0_2] : memref<1x256xf32, #tpu.memory_space<vmem>>, vector<1x256xf32>
    %c0_3 = arith.constant 0 : index
    %c0_4 = arith.constant 0 : index
    %2 = vector.load %arg4[%c0_3, %c0_4] : memref<8x256xf32, #tpu.memory_space<vmem>>, vector<8x256xf32>
    %c0_5 = arith.constant 0 : index
    %c0_6 = arith.constant 0 : index
    %3 = vector.load %arg5[%c0_5, %c0_6] : memref<8x256xf32, #tpu.memory_space<vmem>>, vector<8x256xf32>
    %4 = vector.broadcast %0 : vector<1x256xf32> to vector<8x256xf32>
    %5 = arith.mulf %2, %4 : vector<8x256xf32>
    %6 = vector.broadcast %1 : vector<1x256xf32> to vector<8x256xf32>
    %7 = arith.mulf %3, %6 : vector<8x256xf32>
    %8 = arith.subf %5, %7 : vector<8x256xf32>
    %c0_7 = arith.constant 0 : index
    %c0_8 = arith.constant 0 : index
    %9 = vector.load %arg6[%c0_7, %c0_8] : memref<8x256xf32, #tpu.memory_space<vmem>>, vector<8x256xf32>
    tpu.vector_store %arg6[%c0_7, %c0_8], %8 {strides = array<i32>} : memref<8x256xf32, #tpu.memory_space<vmem>>, vector<8x256xf32>,
    %10 = vector.broadcast %1 : vector<1x256xf32> to vector<8x256xf32>
    %11 = arith.mulf %2, %10 : vector<8x256xf32>
    %12 = vector.broadcast %0 : vector<1x256xf32> to vector<8x256xf32>
    %13 = arith.mulf %3, %12 : vector<8x256xf32>
    %14 = arith.addf %11, %13 : vector<8x256xf32>
    %c0_9 = arith.constant 0 : index
    %c0_10 = arith.constant 0 : index
    %15 = vector.load %arg7[%c0_9, %c0_10] : memref<8x256xf32, #tpu.memory_space<vmem>>, vector<8x256xf32>
    tpu.vector_store %arg7[%c0_9, %c0_10], %14 {strides = array<i32>} : memref<8x256xf32, #tpu.memory_space<vmem>>, vector<8x256xf32>,
    return
  }
  func.func @transform_0(%arg0: i32, %arg1: i32) -> (i32, i32) {
    %c0_i32 = arith.constant 0 : i32
    %c0_i32_0 = arith.constant 0 : i32
    return %c0_i32, %arg1 : i32, i32
  }
  func.func @transform_1(%arg0: i32, %arg1: i32) -> (i32, i32) {
    %c0_i32 = arith.constant 0 : i32
    %c0_i32_0 = arith.constant 0 : i32
    return %c0_i32, %arg1 : i32, i32
  }
  func.func @transform_2(%arg0: i32, %arg1: i32) -> (i32, i32) {
    %c0_i32 = arith.constant 0 : i32
    return %arg0, %arg1 : i32, i32
  }
  func.func @transform_3(%arg0: i32, %arg1: i32) -> (i32, i32) {
    %c0_i32 = arith.constant 0 : i32
    return %arg0, %arg1 : i32, i32
  }
  func.func @transform_4(%arg0: i32, %arg1: i32) -> (i32, i32) {
    %c0_i32 = arith.constant 0 : i32
    return %arg0, %arg1 : i32, i32
  }
  func.func @transform_5(%arg0: i32, %arg1: i32) -> (i32, i32) {
    %c0_i32 = arith.constant 0 : i32
    return %arg0, %arg1 : i32, i32
  }
}

</mosaic_0001>

<bundles_post_ra>
// kernel: phase_mask_quantized.1
= control target key start
LH: loop header
LB: loop body
LE: loop exit
PB: predicated region body
PF: predicated region fallthrough
CT: control target
= control target key end

     0   :  { %v26_v0 = vlaneseq  ;;  %s131_s0 = inlined_call_operand.vmem [shape: f32[1,256], index: 0, kind: input, shape index: {}]   ;;  %s132_s1 = inlined_call_operand.vmem [shape: f32[1,256], index: 1, kind: input, shape index: {}]   ;;  %s133_s2 = inlined_call_operand.vmem [shape: f32[8,256], index: 2, kind: input, shape index: {}]   ;;  %s134_s3 = inlined_call_operand.vmem [shape: f32[8,256], index: 3, kind: input, shape index: {}]   ;;  %s135_s4 = inlined_call_operand.vmem [shape: f32[8,256], index: 4, kind: output, shape index: {0}]   ;;  %s136_s5 = inlined_call_operand.vmem [shape: f32[8,256], index: 5, kind: output, shape index: {1}]  }
   0x1   :  { %v19_v2 = vld [vmem:[%s131_s0] sm:$0x3]  ;;  %v22_v8 = vld [vmem:[%s133_s2 + $0x8] sm:$0xff] }
   0x2   :  { %v27_v1 = vshrl.u32 %v26_v0, 7  ;;  %v20_v3 = vld [vmem:[%s132_s1] sm:$0x3]  ;;  %v24_v9 = vld [vmem:[%s134_s3 + $0x8] sm:$0xff] }
   0x3   :  { %v21_v4 = vld [vmem:[%s133_s2] sm:$0xff] }
   0x4   :  { %v28_v5 = vsub.s32 0, %v27_v1  ;;  %v32_v6 = vsub.s32 1, %v27_v1  ;;  %v23_v7 = vld [vmem:[%s134_s3] sm:$0xff] }
   0x6   :  { %v29_v10 = vrot.slane %v19_v2, %v28_v5  ;;  %v42_v11 = vrot.slane %v20_v3, %v28_v5  ;;  %v33_v12 = vrot.slane %v19_v2, %v32_v6  ;;  %v46_v13 = vrot.slane %v20_v3, %v32_v6 }
   0x8   :  { %v36_v14 = vmul.f32 %v29_v10, %v21_v4  ;;  %v49_v15 = vmul.f32 %v42_v11, %v23_v7  ;;  %v37_v16 = vmul.f32 %v33_v12, %v22_v8  ;;  %v50_v17 = vmul.f32 %v46_v13, %v24_v9 }
   0x9   :  { %v55_v18 = vmul.f32 %v42_v11, %v21_v4  ;;  %v57_v19 = vmul.f32 %v29_v10, %v23_v7  ;;  %v56_v20 = vmul.f32 %v46_v13, %v22_v8  ;;  %v58_v21 = vmul.f32 %v33_v12, %v24_v9 }
   0xa   :  { %v51_v22 = vsub.f32 %v36_v14, %v49_v15  ;;  %v52_v23 = vsub.f32 %v37_v16, %v50_v17 }
   0xb   :  { %v59_v24 = vadd.f32 %v57_v19, %v55_v18  ;;  %v60_v25 = vadd.f32 %v58_v21, %v56_v20 }
   0xc   :  { %53 = vst [vmem:[%s135_s4] sm:$0xff] %v51_v22  ;;  %54 = vst [vmem:[%s135_s4 + $0x8] sm:$0xff] %v52_v23 }
   0xd   :  { %61 = vst [vmem:[%s136_s5] sm:$0xff] %v59_v24  ;;  %62 = vst [vmem:[%s136_s5 + $0x8] sm:$0xff] %v60_v25 }

</bundles_post_ra>
